<compile_context>
chip_gen: v6e
topology: v6e:2x2x1
jax: 0.10.0
libtpu: 0.0.40
codegen_flags: <defaults>
</compile_context>

<pallas_src>
import functools

import jax
import jax.numpy as jnp
from jax.experimental import pallas as pl
from jax.experimental.pallas import tpu as pltpu

_VMEM_LIMIT = 32 * 1024 * 1024   # explicit scoped-VMEM limit (raises v5e's 16 MiB default)


# --------------------------- kernels ---------------------------------------------------

def _attention_map_kernel(xsg_ref, wcat_ref, bsum_ref, wa_ref, ba_ref, att_ref):
    """Per-batch attention map: fused 1x1 convs + Cg->1 projection + relu + sigmoid."""
    s = xsg_ref[0]                                                       # [Cx+Cg, M]
    xg = jnp.dot(wcat_ref[...], s,
                 preferred_element_type=jnp.float32) + bsum_ref[...]     # [Cg, M]
    # Cg -> 1 "activation" conv on the VPU (an MXU matmul would yield one useful
    # sublane per result tile); sublane reduce goes to the XLU.
    logit = jnp.sum(wa_ref[...] * xg, axis=0, keepdims=True) + ba_ref[...]   # [1, M]
    att_ref[0] = jax.nn.sigmoid(jnp.maximum(logit, 0.0))                 # sigmoid(relu(.))


def _gate_kernel(att_ref, rrow_ref, rcolT_ref, x_ref, out_ref):
    """Streaming gate: separable bilinear upsample of att for this row tile, then x * up."""
    tmp = jnp.dot(att_ref[0], rcolT_ref[...],
                  preferred_element_type=jnp.float32)                    # [w, H]
    up = jnp.dot(rrow_ref[...], tmp,
                 preferred_element_type=jnp.float32)                     # [Tr, H]
    out_ref[0] = (x_ref[0] * up[None, :, :]).astype(out_ref.dtype)       # broadcast over Cx


# --------------------------- wrapper ----------------------------------------------------

def _interp_matrix(out_size, in_size):
    """1-D bilinear (align_corners=True) interpolation matrix R such that out = R @ in."""
    if out_size == 1:
        src = jnp.zeros((1,), jnp.float32)
    else:
        src = jnp.arange(out_size, dtype=jnp.float32) * ((in_size - 1) / (out_size - 1))
    i0 = jnp.clip(jnp.floor(src).astype(jnp.int32), 0, in_size - 1)
    i1 = jnp.minimum(i0 + 1, in_size - 1)
    frac = src - i0.astype(jnp.float32)
    rows = jnp.arange(out_size)
    r = jnp.zeros((out_size, in_size), jnp.float32)
    r = r.at[rows, i0].add(1.0 - frac)
    r = r.at[rows, i1].add(frac)
    return r


def _pick_row_tile(W, H, Cx, budget_bytes):
    """Largest divisor Tr of W (Tr % 8 == 0 or Tr == W) whose x tile fits the byte budget."""
    cands = [t for t in range(W, 0, -1) if W % t == 0 and (t == W or t % 8 == 0)]
    for t in cands:
        if Cx * t * H * 4 <= budget_bytes:
            return t
    return cands[-1]   # best effort: smallest legal tile


def attention_gating_block(g, x, params, *, tile_budget_bytes=4 << 20):
    """g: [B, Cg, w, h], x: [B, Cx, W, H] (NCHW), with W == 2*w and H == 2*h."""
    wg, bg, wx, bx, wa, ba = (params[k] for k in ("wg", "bg", "wx", "bx", "wa", "ba"))
    B, Cg, w, h = g.shape
    _, Cx, W, H = x.shape
    # The stride-2 1x1 conv output equals g's spatial size only for even W, H.
    assert W == 2 * w and H == 2 * h, "AttentionGatingBlock requires W == 2*w, H == 2*h"
    M = w * h
    C = Cx + Cg

    # Layout plumbing: stride-2 sampling of x + channel-stack with g for the fused matmul.
    # TODO(synk): the ::2 subsample is materialized host-side (~+12% HBM traffic); a
    # strided in-kernel DMA of only even rows/cols is not expressible with BlockSpec.
    xsg = jnp.concatenate([x[:, :, ::2, ::2], g], axis=1).reshape(B, C, M)
    wcat = jnp.concatenate([wx, wg], axis=1)             # [Cg, Cx+Cg]
    bsum = (bx + bg).reshape(Cg, 1)                      # fused conv biases
    wa_col = wa.reshape(Cg, 1)
    ba2 = ba.reshape(1, 1)

    # --- kernel A: per-batch attention map (tiny) ------------------------------------
    att = pl.pallas_call(
        _attention_map_kernel,
        out_shape=jax.ShapeDtypeStruct((B, 1, M), jnp.float32),
        grid_spec=pltpu.PrefetchScalarGridSpec(
            num_scalar_prefetch=0,
            grid=(B,),
            in_specs=[
                pl.BlockSpec((1, C, M), lambda b: (b, 0, 0)),
                pl.BlockSpec((Cg, C), lambda b: (0, 0)),
                pl.BlockSpec((Cg, 1), lambda b: (0, 0)),
                pl.BlockSpec((Cg, 1), lambda b: (0, 0)),
                pl.BlockSpec((1, 1), lambda b: (0, 0)),
            ],
            out_specs=pl.BlockSpec((1, 1, M), lambda b: (b, 0, 0)),
        ),
        compiler_params=pltpu.CompilerParams(
            dimension_semantics=("parallel",),
            vmem_limit_bytes=_VMEM_LIMIT),
    )(xsg, wcat, bsum, wa_col, ba2)
    att2d = att.reshape(B, w, h)                         # free layout reshape between calls

    # --- kernel B: memory-bound gating over lane-dense row tiles ----------------------
    r_row = _interp_matrix(W, w)                         # [W, w]
    r_colT = _interp_matrix(H, h).T                      # [h, H]
    Tr = _pick_row_tile(W, H, Cx, tile_budget_bytes)
    n_tiles = W // Tr

    out = pl.pallas_call(
        _gate_kernel,
        out_shape=jax.ShapeDtypeStruct((B, Cx, W, H), x.dtype),
        grid_spec=pltpu.PrefetchScalarGridSpec(
            num_scalar_prefetch=0,
            grid=(B, n_tiles),
            in_specs=[
                pl.BlockSpec((1, w, h), lambda b, t: (b, 0, 0)),          # att map (per batch)
                pl.BlockSpec((Tr, w), lambda b, t: (t, 0)),               # row-interp slice
                pl.BlockSpec((h, H), lambda b, t: (0, 0)),                # col-interp (tiny)
                pl.BlockSpec((1, Cx, Tr, H), lambda b, t: (b, 0, t, 0)),  # x row tile
            ],
            out_specs=pl.BlockSpec((1, Cx, Tr, H), lambda b, t: (b, 0, t, 0)),
        ),
        compiler_params=pltpu.CompilerParams(
            dimension_semantics=("parallel", "parallel"),
            vmem_limit_bytes=_VMEM_LIMIT),
    )(att2d, r_row, r_colT, x)
    return out


# --------------------------- pure-JAX reference -----------------------------------------

def reference(g, x, params):
    """Pure-JAX NCHW reference matching the PyTorch forward."""
    wg, bg, wx, bx, wa, ba = (params[k] for k in ("wg", "bg", "wx", "bx", "wa", "ba"))
    xs = x[:, :, ::2, ::2]
    x1 = jnp.einsum('oc,bcij->boij', wx, xs) + bx[None, :, None, None]
    g1 = jnp.einsum('oc,bcij->boij', wg, g) + bg[None, :, None, None]
    xg = x1 + g1
    logit = jnp.einsum('oc,bcij->boij', wa, xg) + ba[None, :, None, None]
    att = jax.nn.sigmoid(jnp.maximum(logit, 0.0))                      # [B, 1, w, h]
    r_row = _interp_matrix(x.shape[2], g.shape[2])
    r_col = _interp_matrix(x.shape[3], g.shape[3])
    up = jnp.einsum('Ii,bcij,Jj->bcIJ', r_row, att, r_col)             # bilinear, align_corners
    return x * up


if __name__ == "__main__":
    key = jax.random.PRNGKey(0)
    B, Cg, Cx = 2, 8, 4
    W = H = 16
    w, h = W // 2, H // 2

    ks = jax.random.split(key, 8)
    g = jax.random.normal(ks[0], (B, Cg, w, h), jnp.float32)
    x = jax.random.normal(ks[1], (B, Cx, W, H), jnp.float32)

    # Deterministic parameter init (1x1 conv weights squeezed to [out, in]).
    params = dict(
        wg=jax.random.normal(ks[2], (Cg, Cg), jnp.float32) / jnp.sqrt(Cg),
        bg=0.1 * jax.random.normal(ks[3], (Cg,), jnp.float32),
        wx=jax.random.normal(ks[4], (Cg, Cx), jnp.float32) / jnp.sqrt(Cx),
        bx=0.1 * jax.random.normal(ks[5], (Cg,), jnp.float32),
        wa=jax.random.normal(ks[6], (1, Cg), jnp.float32) / jnp.sqrt(Cg),
        ba=0.1 * jax.random.normal(ks[7], (1,), jnp.float32),
    )

    # Small tile budget so the test also exercises the multi-tile (grid=(B, 2)) gate path.
    fn = jax.jit(functools.partial(attention_gating_block, tile_budget_bytes=2048))
    out = jax.block_until_ready(fn(g, x, params))
    ref = reference(g, x, params)

    assert out.shape == x.shape
    assert bool(jnp.allclose(out, ref, atol=1e-4, rtol=1e-4))
    print("KERNEL_OK")
</pallas_src>

<mosaic_0001>
module attributes {stable_mosaic.version = 11 : i64} {
  func.func private @main(%arg0: i32) attributes {dimension_semantics = [#tpu.dimension_semantics<core_parallel>], iteration_bounds = array<i64: 2>, tpu.core_type = #tpu.core_type<sc_scalar_subcore>, window_params = []} {
    return
  }
}

module attributes {stable_mosaic.version = 11 : i64} {
  func.func private @main(%arg0: i32) attributes {dimension_semantics = [#tpu.dimension_semantics<core_parallel>], iteration_bounds = array<i64: 2>, tpu.core_type = #tpu.core_type<sc_scalar_subcore>, window_params = []} {
    return
  }
}

module attributes {stable_mosaic.version = 11 : i64} {
  func.func @_attention_map_kernel(%arg0: i32, %arg1: memref<1x12x64xf32, #tpu.memory_space<vmem>>, %arg2: memref<8x12xf32, #tpu.memory_space<vmem>>, %arg3: memref<8x1xf32, #tpu.memory_space<vmem>>, %arg4: memref<8x1xf32, #tpu.memory_space<vmem>>, %arg5: memref<1x1xf32, #tpu.memory_space<vmem>>, %arg6: memref<1x1x64xf32, #tpu.memory_space<vmem>>) attributes {dimension_semantics = [#tpu.dimension_semantics<parallel>], iteration_bounds = array<i64: 2>, scalar_prefetch = 0 : i64, scratch_operands = 0 : i64, tpu.core_type = #tpu.core_type<tc>, window_params = [{transform_indices = @transform_0, window_bounds = array<i64: 1, 12, 64>}, {pipeline_mode = #tpu.pipeline_mode<synchronous>, transform_indices = @transform_1, window_bounds = array<i64: 8, 12>}, {pipeline_mode = #tpu.pipeline_mode<synchronous>, transform_indices = @transform_2, window_bounds = array<i64: 8, 1>}, {pipeline_mode = #tpu.pipeline_mode<synchronous>, transform_indices = @transform_3, window_bounds = array<i64: 8, 1>}, {pipeline_mode = #tpu.pipeline_mode<synchronous>, transform_indices = @transform_4, window_bounds = array<i64: 1, 1>}, {transform_indices = @transform_5, window_bounds = array<i64: 1, 1, 64>}]} {
    %c0 = arith.constant 0 : index
    %c0_0 = arith.constant 0 : index
    %c0_1 = arith.constant 0 : index
    %0 = vector.load %arg1[%c0, %c0_0, %c0_1] : memref<1x12x64xf32, #tpu.memory_space<vmem>>, vector<1x12x64xf32>
    %1 = vector.shape_cast %0 : vector<1x12x64xf32> to vector<12x64xf32>
    %c0_2 = arith.constant 0 : index
    %c0_3 = arith.constant 0 : index
    %2 = vector.load %arg2[%c0_2, %c0_3] : memref<8x12xf32, #tpu.memory_space<vmem>>, vector<8x12xf32>
    %cst = arith.constant dense<0.000000e+00> : vector<8x64xf32>
    %3 = tpu.matmul %2, %1, %cst {dimension_numbers = #tpu.dot_dimension_numbers<[1], [0], [0], [1], [0, 0, 1, 1], [], []>} : vector<8x12xf32>, vector<12x64xf32>, vector<8x64xf32> -> vector<8x64xf32>
    %c0_4 = arith.constant 0 : index
    %c0_5 = arith.constant 0 : index
    %4 = vector.load %arg3[%c0_4, %c0_5] : memref<8x1xf32, #tpu.memory_space<vmem>>, vector<8x1xf32>
    %5 = vector.broadcast %4 : vector<8x1xf32> to vector<8x64xf32>
    %6 = arith.addf %3, %5 : vector<8x64xf32>
    %c0_6 = arith.constant 0 : index
    %c0_7 = arith.constant 0 : index
    %7 = vector.load %arg4[%c0_6, %c0_7] : memref<8x1xf32, #tpu.memory_space<vmem>>, vector<8x1xf32>
    %8 = vector.broadcast %7 : vector<8x1xf32> to vector<8x64xf32>
    %9 = arith.mulf %8, %6 : vector<8x64xf32>
    %cst_8 = arith.constant dense<0.000000e+00> : vector<64xf32>
    %10 = vector.multi_reduction <add>, %9, %cst_8 [0] : vector<8x64xf32> to vector<64xf32>
    %11 = vector.shape_cast %10 : vector<64xf32> to vector<1x64xf32>
    %c0_9 = arith.constant 0 : index
    %c0_10 = arith.constant 0 : index
    %12 = vector.load %arg5[%c0_9, %c0_10] : memref<1x1xf32, #tpu.memory_space<vmem>>, vector<1x1xf32>
    %13 = vector.broadcast %12 : vector<1x1xf32> to vector<1x64xf32>
    %14 = arith.addf %11, %13 : vector<1x64xf32>
    %cst_11 = arith.constant 0.000000e+00 : f32
    %15 = vector.broadcast %cst_11 : f32 to vector<1x64xf32>
    %16 = arith.maximumf %14, %15 : vector<1x64xf32>
    %17 = arith.negf %16 : vector<1x64xf32>
    %18 = math.exp %17 : vector<1x64xf32>
    %cst_12 = arith.constant 1.000000e+00 : f32
    %19 = vector.broadcast %cst_12 : f32 to vector<1x64xf32>
    %20 = arith.addf %19, %18 : vector<1x64xf32>
    %21 = arith.divf %19, %20 : vector<1x64xf32>
    %c0_13 = arith.constant 0 : index
    %c0_14 = arith.constant 0 : index
    %c0_15 = arith.constant 0 : index
    %22 = vector.load %arg6[%c0_13, %c0_14, %c0_15] : memref<1x1x64xf32, #tpu.memory_space<vmem>>, vector<1x1x64xf32>
    %23 = vector.shape_cast %22 : vector<1x1x64xf32> to vector<1x64xf32>
    %24 = vector.shape_cast %21 : vector<1x64xf32> to vector<1x1x64xf32>
    tpu.vector_store %arg6[%c0_13, %c0_14, %c0_15], %24 {strides = array<i32>} : memref<1x1x64xf32, #tpu.memory_space<vmem>>, vector<1x1x64xf32>,
    return
  }
  func.func @transform_0(%arg0: i32) -> (i32, i32, i32) {
    %c0_i32 = arith.constant 0 : i32
    %c0_i32_0 = arith.constant 0 : i32
    %c0_i32_1 = arith.constant 0 : i32
    return %arg0, %c0_i32, %c0_i32_0 : i32, i32, i32
  }
  func.func @transform_1(%arg0: i32) -> (i32, i32) {
    %c0_i32 = arith.constant 0 : i32
    %c0_i32_0 = arith.constant 0 : i32
    %c0_i32_1 = arith.constant 0 : i32
    return %c0_i32, %c0_i32_0 : i32, i32
  }
  func.func @transform_2(%arg0: i32) -> (i32, i32) {
    %c0_i32 = arith.constant 0 : i32
    %c0_i32_0 = arith.constant 0 : i32
    %c0_i32_1 = arith.constant 0 : i32
    return %c0_i32, %c0_i32_0 : i32, i32
  }
  func.func @transform_3(%arg0: i32) -> (i32, i32) {
    %c0_i32 = arith.constant 0 : i32
    %c0_i32_0 = arith.constant 0 : i32
    %c0_i32_1 = arith.constant 0 : i32
    return %c0_i32, %c0_i32_0 : i32, i32
  }
  func.func @transform_4(%arg0: i32) -> (i32, i32) {
    %c0_i32 = arith.constant 0 : i32
    %c0_i32_0 = arith.constant 0 : i32
    %c0_i32_1 = arith.constant 0 : i32
    return %c0_i32, %c0_i32_0 : i32, i32
  }
  func.func @transform_5(%arg0: i32) -> (i32, i32, i32) {
    %c0_i32 = arith.constant 0 : i32
    %c0_i32_0 = arith.constant 0 : i32
    %c0_i32_1 = arith.constant 0 : i32
    return %arg0, %c0_i32, %c0_i32_0 : i32, i32, i32
  }
}

module attributes {stable_mosaic.version = 11 : i64} {
  func.func @_gate_kernel(%arg0: i32, %arg1: i32, %arg2: memref<1x8x8xf32, #tpu.memory_space<vmem>>, %arg3: memref<8x8xf32, #tpu.memory_space<vmem>>, %arg4: memref<8x16xf32, #tpu.memory_space<vmem>>, %arg5: memref<1x4x8x16xf32, #tpu.memory_space<vmem>>, %arg6: memref<1x4x8x16xf32, #tpu.memory_space<vmem>>) attributes {dimension_semantics = [#tpu.dimension_semantics<parallel>, #tpu.dimension_semantics<parallel>], iteration_bounds = array<i64: 2, 2>, scalar_prefetch = 0 : i64, scratch_operands = 0 : i64, tpu.core_type = #tpu.core_type<tc>, window_params = [{transform_indices = @transform_0, window_bounds = array<i64: 1, 8, 8>}, {transform_indices = @transform_1, window_bounds = array<i64: 8, 8>}, {pipeline_mode = #tpu.pipeline_mode<synchronous>, transform_indices = @transform_2, window_bounds = array<i64: 8, 16>}, {transform_indices = @transform_3, window_bounds = array<i64: 1, 4, 8, 16>}, {transform_indices = @transform_4, window_bounds = array<i64: 1, 4, 8, 16>}]} {
    %c0 = arith.constant 0 : index
    %c0_0 = arith.constant 0 : index
    %c0_1 = arith.constant 0 : index
    %0 = vector.load %arg2[%c0, %c0_0, %c0_1] : memref<1x8x8xf32, #tpu.memory_space<vmem>>, vector<1x8x8xf32>
    %1 = vector.shape_cast %0 : vector<1x8x8xf32> to vector<8x8xf32>
    %c0_2 = arith.constant 0 : index
    %c0_3 = arith.constant 0 : index
    %2 = vector.load %arg4[%c0_2, %c0_3] : memref<8x16xf32, #tpu.memory_space<vmem>>, vector<8x16xf32>
    %cst = arith.constant dense<0.000000e+00> : vector<8x16xf32>
    %3 = tpu.matmul %1, %2, %cst {dimension_numbers = #tpu.dot_dimension_numbers<[1], [0], [0], [1], [0, 0, 1, 1], [], []>} : vector<8x8xf32>, vector<8x16xf32>, vector<8x16xf32> -> vector<8x16xf32>
    %c0_4 = arith.constant 0 : index
    %c0_5 = arith.constant 0 : index
    %4 = vector.load %arg3[%c0_4, %c0_5] : memref<8x8xf32, #tpu.memory_space<vmem>>, vector<8x8xf32>
    %cst_6 = arith.constant dense<0.000000e+00> : vector<8x16xf32>
    %5 = tpu.matmul %4, %3, %cst_6 {dimension_numbers = #tpu.dot_dimension_numbers<[1], [0], [0], [1], [0, 0, 1, 1], [], []>} : vector<8x8xf32>, vector<8x16xf32>, vector<8x16xf32> -> vector<8x16xf32>
    %c0_7 = arith.constant 0 : index
    %c0_8 = arith.constant 0 : index
    %c0_9 = arith.constant 0 : index
    %c0_10 = arith.constant 0 : index
    %6 = vector.load %arg5[%c0_7, %c0_8, %c0_9, %c0_10] : memref<1x4x8x16xf32, #tpu.memory_space<vmem>>, vector<1x4x8x16xf32>
    %7 = vector.shape_cast %6 : vector<1x4x8x16xf32> to vector<4x8x16xf32>
    %8 = vector.shape_cast %5 : vector<8x16xf32> to vector<1x8x16xf32>
    %9 = vector.broadcast %8 : vector<1x8x16xf32> to vector<4x8x16xf32>
    %10 = arith.mulf %7, %9 : vector<4x8x16xf32>
    %c0_11 = arith.constant 0 : index
    %c0_12 = arith.constant 0 : index
    %c0_13 = arith.constant 0 : index
    %c0_14 = arith.constant 0 : index
    %11 = vector.load %arg6[%c0_11, %c0_12, %c0_13, %c0_14] : memref<1x4x8x16xf32, #tpu.memory_space<vmem>>, vector<1x4x8x16xf32>
    %12 = vector.shape_cast %11 : vector<1x4x8x16xf32> to vector<4x8x16xf32>
    %13 = vector.shape_cast %10 : vector<4x8x16xf32> to vector<1x4x8x16xf32>
    tpu.vector_store %arg6[%c0_11, %c0_12, %c0_13, %c0_14], %13 {strides = array<i32>} : memref<1x4x8x16xf32, #tpu.memory_space<vmem>>, vector<1x4x8x16xf32>,
    return
  }
  func.func @transform_0(%arg0: i32, %arg1: i32) -> (i32, i32, i32) {
    %c0_i32 = arith.constant 0 : i32
    %c0_i32_0 = arith.constant 0 : i32
    %c0_i32_1 = arith.constant 0 : i32
    return %arg0, %c0_i32, %c0_i32_0 : i32, i32, i32
  }
  func.func @transform_1(%arg0: i32, %arg1: i32) -> (i32, i32) {
    %c0_i32 = arith.constant 0 : i32
    %c0_i32_0 = arith.constant 0 : i32
    return %arg1, %c0_i32 : i32, i32
  }
  func.func @transform_2(%arg0: i32, %arg1: i32) -> (i32, i32) {
    %c0_i32 = arith.constant 0 : i32
    %c0_i32_0 = arith.constant 0 : i32
    %c0_i32_1 = arith.constant 0 : i32
    return %c0_i32, %c0_i32_0 : i32, i32
  }
  func.func @transform_3(%arg0: i32, %arg1: i32) -> (i32, i32, i32, i32) {
    %c0_i32 = arith.constant 0 : i32
    %c0_i32_0 = arith.constant 0 : i32
    %c0_i32_1 = arith.constant 0 : i32
    return %arg0, %c0_i32, %arg1, %c0_i32_0 : i32, i32, i32, i32
  }
  func.func @transform_4(%arg0: i32, %arg1: i32) -> (i32, i32, i32, i32) {
    %c0_i32 = arith.constant 0 : i32
    %c0_i32_0 = arith.constant 0 : i32
    %c0_i32_1 = arith.constant 0 : i32
    return %arg0, %c0_i32, %arg1, %c0_i32_0 : i32, i32, i32, i32
  }
}

</mosaic_0001>

<bundles_post_ra>
// kernel: attention_gating_block.2
= control target key start
LH: loop header
LB: loop body
LE: loop exit
PB: predicated region body
PF: predicated region fallthrough
CT: control target
= control target key end

     0   :  { %s476_s20 = smov 0   ;;  %s506_s0 = inlined_call_operand.vmem [shape: f32[2,12,64], index: 0, kind: input, shape index: {}]   ;;  %s507_s1 = inlined_call_operand.vmem [shape: f32[8,12], index: 1, kind: input, shape index: {}]   ;;  %s508_s2 = inlined_call_operand.vmem [shape: f32[8,1], index: 2, kind: input, shape index: {}]   ;;  %s509_s3 = inlined_call_operand.vmem [shape: f32[8,1], index: 3, kind: input, shape index: {}]   ;;  %s510_s4 = inlined_call_operand.<no memory space> [shape: f32[1,1], index: 4, kind: input, shape index: {}]   ;;  %s511_s5 = inlined_call_operand.vmem [shape: f32[2,1,64], index: 5, kind: output, shape index: {}]  }
   0x1   :  { %v10_v0 = vstv %s510_s4 }
   0x2   :  { %11 = vst [vmem:[#allocation2] sm:$0x1] %v10_v0 }
   0x3 LB: > { %s392_s21 = sadd.s32 4294967295, %s438_s20   ;;  %p396_p0 = scmp.ge.s32.totalorder %s438_s20, 1  ;;  %s438_s20 = sphi %s476_s20, %s17_s20  }
   0x4   : > { %p189_p1 = scmp.lt.s32.totalorder %s438_s20, 3 }
   0x6   : > { %p190_p2 = pnand %p396_p0, %p189_p1 }
   0x7   : > { %p215_p3 = scmp.lt.s32.totalorder (!%p190_p2), %s392_s21, 1 }
   0x8   : > { %193 = sbr.rel (%p190_p2) target bundleno = 267 (0x10b), region = 40 }
   0xd   : > { %v440_v1 = vmov 0.0   ;;  %vm441_vm0 = vmmov 0   ;;  %v226_v2 = vld [vmem:[%s508_s2] sm:$0xff]  ;;  %s513_s21 = smov (!%p215_p3, %s392_s21), 1  ;;  %v442_v4 = vmov 0   ;;  %vm236_vm1 = vcmask 1043456  }
   0xe   : > { %408 = vmatprep.subr.mxu0 %v440_v1  ;;  %412 = vmatprep.mubr.msk.f32.mxu0 %vm441_vm0, %v440_v1  ;;  %v325_v3 = vld [vmem:[#allocation2] sm:$0x1]  ;;  %s404_s23 = sshll.u32 %s513_s21, 4  ;;  %vm232_vm2 = vcmask 97280   ;;  %vm317_vm3 = vcmask 523264   ;;  %v331_v14 = vlaneseq  ;;  %s222_s8 = scalar_lea.vmem %s511_s5, %s513_s21  ;;  %vm343_vm4 = vcmask 516096  }
   0xf   : > { %426 = vset.pattern.permute.xlu0 %v442_v4  ;;  %427 = vset.pattern.permute.xlu1 %v442_v4  ;;  %v310_v5 = vld [vmem:[%s509_s3] sm:$0xff]  ;;  %s219_s28 = scalar_lea.vmem %s506_s0, %s404_s23 }
  0x10   : > { %229 = vperm.xlu0 %426, %v226_v2   ;;  %328 = vperm.xlu1 %427, %v325_v3   ;;  %v224_v6 = vld [vmem:[%s219_s28 + $0x8] sm:$0xf]  ;;  %v223_v7 = vld [vmem:[%s219_s28] sm:$0xff]  ;;  %v332_v18 = vshrl.u32 %v331_v14, 7 }
  0x11   : > { %409 = vmatpush3.msk.msra.mxu0 %vm236_vm1, %v224_v6  ;;  %v225_v8 = vld [vmem:[%s507_s1] sm:$0xff] }
  0x12   : > { %410 = vmatprep.subr.mxu0 %v440_v1  ;;  %v333_v21 = vsub.s32 0, %v332_v18 }
  0x13   : > { %411 = vmatpush3.msra.mxu0 %v223_v7 }
  0x14   : > { %313 = vperm.xlu0 %426, %v310_v5   ;;  %413 = vmatmul.mubr.msk.f32.vlgmr.msra.gmra.mxu0 %vm232_vm2, %v225_v8 }
  0x8b   : > { %v230_v9 = vpop.permute.xlu0 %229  ;;  %v329_v22 = vpop.permute.xlu1 %328 }
  0x8c   : > { %v334_v25 = vrot.slane %v329_v22, %v333_v21 }
  0x8f   : > { %v314_v12 = vpop.permute.xlu0 %313 }
  0xd4   : > { %v306_v10 = vpop.f32.mrf.mxu0 }
  0xd5   : > { %v307_v11 = vadd.f32 %v306_v10, %v230_v9 }
  0xd6   : > { %v414_v13 = vpop.f32.mrf.mxu0 }
  0xd7   : > { %v316_v15 = vmul.f32 %v314_v12, %v307_v11 }
  0xd9   : > { %v318_v16 = vsel %vm317_vm3, %v316_v15, 0.0 }
  0xda   : > { %v319_v17 = vrot.slane %v318_v16, 4 }
  0xdc   : > { %v320_v19 = vadd.f32 %v319_v17, %v318_v16 }
  0xde   : > { %v321_v20 = vrot.slane %v320_v19, 2 }
  0xe0   : > { %v322_v23 = vadd.f32 %v321_v20, %v320_v19 }
  0xe2   : > { %v323_v24 = vrot.slane %v322_v23, 1 }
  0xe4   : > { %v324_v26 = vadd.f32 %v323_v24, %v322_v23 }
  0xe6   : > { %v335_v27 = vadd.f32 %v334_v25, %v324_v26 }
  0xe8   : > { %v336_v28 = vmax.f32 %v335_v27, 0.0 }
  0xea   : > { %v401_v29 = vmul.f32 -1.442695, %v336_v28 }
  0xec   : > { %428 = vpow2.f32 %v401_v29 }
  0xf9   : > { %v429_v30 = vpop.eup %428 }
  0xfa   : > { %v340_v31 = vadd.f32 1.0, %v429_v30 }
  0xfc   : > { %430 = vrcp.f32 %v340_v31 }
 0x109   : > { %v431_v32 = vpop.eup %430 }
 0x10a   : > { %344 = vst.msk [vmem:[%s222_s8] sm:$0x1] %vm343_vm4, %v431_v32 }
 0x10b PF: > { %s17_s20 = sadd.s32 1, %s438_s20  }
 0x10c   : > { %p14_p4 = scmp.ge.s32.totalorder %s17_s20, 4  }
 0x10e   :  { %16 = sbr.rel (!%p14_p4) target bundleno = 3 (0x3), region = 70 }

// kernel: attention_gating_block.3
= control target key start
LH: loop header
LB: loop body
LE: loop exit
PB: predicated region body
PF: predicated region fallthrough
CT: control target
= control target key end

     0   :  { %9 = vsyncpa [#allocation4], 0  ;;  %s973_s0 = inlined_call_operand.vmem [shape: f32[2,8,8], index: 0, kind: input, shape index: {}]   ;;  %s974_s1 = inlined_call_operand.vmem [shape: f32[16,8], index: 1, kind: input, shape index: {}]   ;;  %s975_s2 = inlined_call_operand.vmem [shape: f32[8,16], index: 2, kind: input, shape index: {}]   ;;  %s976_s3 = inlined_call_operand.vmem [shape: f32[2,4,16,16], index: 3, kind: input, shape index: {}]   ;;  %s977_s4 = inlined_call_operand.hbm [shape: f32[2,4,16,16], index: 4, kind: output, shape index: {}]  }
   0x1   :  { %11 = vsyncpa [#allocation4 + $0x1], 0  ;;  %s814_s15 = smov 0   ;;  %s816_s16 = smov 0  }
   0x2   :  { %s818_s17 = smov 0   ;;  %s820_s18 = smov 0  }
   0x3   :  { %s822_s19 = smov 0   ;;  %s824_s20 = smov 0  }
   0x4   :  { %s826_s21 = smov 0   ;;  %s828_s22 = smov 0  }
   0x5 LB: > { %s580_s23 = sadd.s32 4294967295, %s781_s22   ;;  %s581_s24 = sadd.s32 4294967294, %s781_s22   ;;  %s781_s22 = sphi %s828_s22, %s17_s22   ;;  %s777_s21 = sphi %s826_s21, %s987_s21   ;;  %s773_s20 = sphi %s824_s20, %s986_s20   ;;  %s769_s19 = sphi %s822_s19, %s985_s19   ;;  %s765_s18 = sphi %s820_s18, %s984_s18   ;;  %s761_s17 = sphi %s818_s17, %s983_s17   ;;  %s757_s16 = sphi %s816_s16, %s982_s16   ;;  %s753_s15 = sphi %s814_s15, %s981_s15  }
   0x6   : > { %s26_s25 = sadd.s32 1, %s773_s20  ;;  %s29_s26 = sadd.s32 1, %s777_s21 }
   0x7   : > { %p27_p0 = scmp.ge.s32.totalorder %s26_s25, 2  ;;  %p118_p1 = scmp.ne.s32.totalorder %s761_s17, %s757_s16 }
   0x8   : > { %p119_p2 = scmp.eq.s32.totalorder %s781_s22, 0  ;;  %p150_p5 = scmp.eq.s32.totalorder %s580_s23, 3 }
   0x9   : > { %s989_s25 = smov (%p27_p0, %s26_s25), 0  ;;  %s991_s26 = smov (!%p27_p0, %s29_s26), %s777_s21 }
   0xa   : > { %s107_s27 = ssub.s32 %s773_s20, %s989_s25  ;;  %p866_p3 = por %p119_p2, %p118_p1 }
   0xb   : > { %p31_p4 = scmp.ge.s32.totalorder %s991_s26, 2  ;;  %p155_p6 = scmp.ne.s32.totalorder %s757_s16, %s753_s15 }
   0xc   : > { %p156_p7 = scmp.eq.s32.totalorder %s581_s24, 3  ;;  %p874_p8 = por %p150_p5, %p118_p1 }
   0xd   : > { %s993_s26 = smov (%p31_p4, %s991_s26), 0  ;;  %s111_s7 = sadd.s32 1, %s761_s17 }
   0xe   : > { %p878_p9 = por %p156_p7, %p155_p6  ;;  %s106_s5 = ssub.s32 %s777_s21, %s993_s26 }
   0xf   : > { %s108_s6 = sor.u32 %s107_s27, %s106_s5  ;;  %p583_p11 = scmp.ge.s32.totalorder %s781_s22, 4 }
  0x10   : > { %p109_p10 = scmp.eq.s32.totalorder %s108_s6, 0 }
  0x11   : > { %175 = sbr.rel (%p583_p11) target bundleno = 30 (0x1e), region = 20 }
  0x12   : > { %s886_s8 = scalar_select %p109_p10, %s761_s17, %s111_s7  }
  0x16   : > { %192 = sbr.rel (!%p866_p3) target bundleno = 30 (0x1e), region = 32  ;;  %s194_s9 = sand.u32 (%p866_p3), 1, %s761_s17  }
  0x17   : > { %s585_s10 = sshll.u32 (%p866_p3), %s777_s21, 3  ;;  %s584_s11 = sshll.u32 (%p866_p3), %s194_s9, 5 }
  0x18   : > { %s198_s12 = sadd.s32 (%p866_p3), %s773_s20, %s585_s10  ;;  %s196_s27 = scalar_lea.vmem (%p866_p3), [#allocation2], %s584_s11 }
  0x19   : > { %s586_s13 = sshll.u32 (%p866_p3), %s198_s12, 3 }
  0x1a   : > { %s200_s24 = scalar_lea.vmem (%p866_p3), %s976_s3, %s586_s13 }
  0x1b   : > { %v235_v0 = vld [vmem:[%s200_s24] sm:$0xff]  ;;  %v237_v1 = vld [vmem:[%s200_s24 + $0x10] sm:$0xff] }
  0x1c   : > { %v239_v2 = vld [vmem:[%s200_s24 + $0x20] sm:$0xff]  ;;  %236 = vst [vmem:[%s196_s27] sm:$0xff] %v235_v0  ;;  %238 = vst [vmem:[%s196_s27 + $0x8] sm:$0xff] %v237_v1  ;;  %v241_v3 = vld [vmem:[%s200_s24 + $0x30] sm:$0xff] }
  0x1d   : > { %240 = vst [vmem:[%s196_s27 + $0x10] sm:$0xff] %v239_v2  ;;  %242 = vst [vmem:[%s196_s27 + $0x18] sm:$0xff] %v241_v3 }
  0x1e PF: > { %p587_p12 = scmp.ge.s32.totalorder %s781_s22, 1  ;;  %p247_p13 = scmp.lt.s32.totalorder %s781_s22, 5 }
  0x20   : > { %p248_p0 = pnand %p587_p12, %p247_p13 }
  0x21   : > { %p287_p1 = scmp.lt.s32.totalorder (!%p248_p0), %s769_s19, 1  ;;  %p291_p2 = scmp.lt.s32.totalorder (!%p248_p0), %s765_s18, 1 }
  0x22   : > { %251 = sbr.rel (%p248_p0) target bundleno = 449 (0x1c1), region = 70  ;;  %s254_s27 = sand.u32 (!%p248_p0), 1, %s757_s16  }
  0x23   : > { %s588_s28 = sshll.u32 (!%p248_p0), %s254_s27, 5  ;;  %s595_s5 = sshll.u32 (!%p248_p0), %s769_s19, 3 }
  0x24   : > { %s286_s9 = scalar_lea.vmem (!%p248_p0), [#allocation3], %s588_s28  ;;  %s256_s10 = scalar_lea.vmem (!%p248_p0), [#allocation2], %s588_s28 }
  0x25   : > { %s785_s23 = smov (!%p248_p0), [#allocation3]  }
  0x27   : > { %v296_v4 = vld [vmem:[%s975_s2] sm:$0xff]  ;;  %v783_v5 = vmov 0.0   ;;  %vm784_vm0 = vmmov 0   ;;  %s288_s6 = scalar_select %p287_p1, %s769_s19, 1  ;;  %vm297_vm1 = vcmask 64512   ;;  %v446_v11 = vld [vmem:[%s256_s10 + $0x8] sm:$0xff] }
  0x28   : > { %603 = vmatprep.subr.mxu0 %v783_v5  ;;  %605 = vmatprep.mubr.msk.f32.mxu0 %vm784_vm0, %v783_v5  ;;  %s292_s12 = scalar_select %p291_p2, %s765_s18, 1  ;;  %v445_v10 = vld [vmem:[%s256_s10] sm:$0xff]  ;;  %v447_v12 = vld [vmem:[%s256_s10 + $0x10] sm:$0xff]  ;;  %v448_v13 = vld [vmem:[%s256_s10 + $0x18] sm:$0xff]  ;;  %vm453_vm2 = vcmask 130048  }
  0x29   : > { %604 = vmatpush3.msra.mxu0 %v296_v4  ;;  %608 = vmatprep.subr.mxu1 %v783_v5  ;;  %s590_s7 = sshll.u32 %s288_s6, 3  ;;  %s470_s6 = sadd.s32 %s765_s18, %s595_s5 }
  0x2a   : > { %610 = vmatprep.mubr.msk.f32.mxu1 %vm784_vm0, %v783_v5  ;;  %s290_s11 = scalar_lea.vmem %s973_s0, %s590_s7  ;;  %s591_s13 = sshll.u32 %s292_s12, 3 }
  0x2b   : > { %v295_v6 = vld [vmem:[%s290_s11] sm:$0xff]  ;;  %s294_s24 = scalar_lea.vmem %s974_s1, %s591_s13  ;;  %s473_s7 = sshll.u32 %s286_s9, 4  ;;  %s915_s7 = int_to_ptr.vmem [resolvable:$true] %s473_s7 }
  0x2c   : > { %606 = vmatmul.mubr.msk.f32.vlgmr.msra.gmra.mxu0 %vm297_vm1, %v295_v6  ;;  %v371_v7 = vld [vmem:[%s294_s24] sm:$0xff]  ;;  %s596_s11 = sshll.u32 %s470_s6, 7  ;;  %s922_s18 = scalar_lea.sflag [#allocation4], %s254_s27 }
  0x2d   : > { %s920_s19 = scalar_lea.hbm %s977_s4, %s596_s11  ;;  %s689_s14 = scalar_lea.vmem %s915_s7, 512 }
  0x2e   : > { %p690_p3 = scmp.ne.s32.totalorder %s915_s7, %s689_s14  ;;  %s693_s24 = sshll.u32 %s785_s23, 4  ;;  %s694_s24 = int_to_ptr.vmem [resolvable:$false] %s693_s24 }
  0x2f   : > { %s695_s28 = scalar_lea.vmem %s694_s24, 1024  ;;  %p696_p6 = scmp.lt.s32.totalorder %s915_s7, %s694_s24 }
  0x30   : > { %p691_p4 = pnand %p690_p3, %p874_p8  ;;  %p697_p7 = scmp.lt.s32.totalorder %s695_s28, %s689_s14 }
  0x32   : > { %p692_p5 = pneg %p691_p4  ;;  %p698_p10 = por %p697_p7, %p696_p6 }
  0x34   : > { %p699_p11 = pnand %p698_p10, %p692_p5 }
  0xec   : > { %v367_v8 = vpop.f32.mrf.mxu0 }
  0xed   : > { %609 = vmatpush3.msra.mxu1 %v367_v8 }
  0xee   : > { %v607_v9 = vpop.f32.mrf.mxu0  ;;  %611 = vmatmul.mubr.msk.f32.vlgmr.msra.gmra.mxu1 %vm297_vm1, %v371_v7 }
 0x1ae   : > { %v441_v14 = vpop.f32.mrf.mxu1 }
 0x1af   : > { %v449_v15 = vmul.f32 %v445_v10, %v441_v14  ;;  %v450_v16 = vmul.f32 %v446_v11, %v441_v14  ;;  %v451_v17 = vmul.f32 %v447_v12, %v441_v14  ;;  %v452_v18 = vmul.f32 %v448_v13, %v441_v14 }
 0x1b0   : > { %v612_v19 = vpop.f32.mrf.mxu1 }
 0x1b1   : > { %454 = vst.msk [vmem:[%s286_s9] sm:$0xff] %vm453_vm2, %v449_v15  ;;  %455 = vst.msk [vmem:[%s286_s9 + $0x8] sm:$0xff] %vm453_vm2, %v450_v16 }
 0x1b2   : > { %456 = vst.msk [vmem:[%s286_s9 + $0x10] sm:$0xff] %vm453_vm2, %v451_v17  ;;  %457 = vst.msk [vmem:[%s286_s9 + $0x18] sm:$0xff] %vm453_vm2, %v452_v18 }
 0x1b3   : > { %702 = shalt.err (!%p699_p11)
}
 0x1b4   : > { %s703_s27 = scalar_lea.hbm %s920_s19, 512  ;;  %s707_s9 = scalar_lea.hbm %s977_s4, 2048 }
 0x1b5   : > { %p704_p12 = scmp.ne.s32.totalorder %s920_s19, %s703_s27  ;;  %p708_p1 = scmp.lt.s32.totalorder %s920_s19, %s977_s4 }
 0x1b6   : > { %p709_p2 = scmp.lt.s32.totalorder %s707_s9, %s703_s27 }
 0x1b7   : > { %p705_p13 = pnand %p704_p12, %p874_p8 }
 0x1b8   : > { %p710_p3 = por %p709_p2, %p708_p1 }
 0x1b9   : > { %p706_p0 = pneg %p705_p13 }
 0x1bb   : > { %p711_p4 = pnand %p710_p3, %p706_p0 }
 0x1bd   : > { %714 = shalt.err (!%p711_p4)
}
 0x1be   : > { %s786_s12 = smov 128   ;;  %s787_s13 = smov 256  }
 0x1bf   : > { %s788_s14 = smov 8  }
 0x1c0   : > { %613 = dma.vmem_to_hbm [thread:$0]  (%p874_p8), %s915_s7, 512, %s920_s19, %s922_s18, %s786_s12, %s787_s13, %s788_s14  }
 0x1c1 PF: > { %p619_p5 = scmp.ge.s32.totalorder %s781_s22, 2  ;;  %s488_s23 = sand.u32 1, %s753_s15  }
 0x1c2   : > { %s489_s24 = scalar_lea.sflag [#allocation4], %s488_s23 }
 0x1c3   : > { %p616_p6 = pnand %p619_p5, %p878_p9 }
 0x1c5   : > { %p617_p7 = pneg %p616_p6 }
 0x1c7   : > { %748 = dma.done.wait (%p617_p7), %s489_s24, 512  }
 0x1c8   : > { %750 = vsyncadd (%p617_p7), %s489_s24, 4294966784  ;;  %s17_s22 = sadd.s32 1, %s781_s22   ;;  %s981_s15 = smov %s757_s16 }
 0x1c9   : > { %p14_p10 = scmp.ge.s32.totalorder %s17_s22, 6   ;;  %s982_s16 = smov %s761_s17 }
 0x1ca   : > { %s983_s17 = smov %s886_s8  ;;  %s984_s18 = smov %s773_s20 }
 0x1cb   : > { %s985_s19 = smov %s777_s21  ;;  %s986_s20 = smov %s989_s25 }
 0x1cc   : > { %s987_s21 = smov %s993_s26  ;;  %16 = sbr.rel (!%p14_p10) target bundleno = 5 (0x5), region = 120 }
 0x1d1   :  { %494 = vsyncpa [#allocation4], 1 }
 0x1d2   :  { %496 = vsyncpa [#allocation4 + $0x1], 1 }

</bundles_post_ra>
